<compile_context>
chip_gen: v5e
topology: v5e:2x2
jax: 0.10.0
libtpu: 0.0.40
codegen_flags: <defaults>
</compile_context>

<pallas_src>
import jax
import jax.numpy as jnp
from jax.experimental import pallas as pl
from jax.experimental.pallas import tpu as pltpu


def _mlp_t_kernel(x1_ref, x2_ref, w1a_ref, w1b_ref, vec_ref, out_ref):
    """Single-invocation kernel; everything resident in VMEM.

    vec_ref layout (3, H):
      row 0        -> folded bias of Linear1            (b1')
      row 1        -> folded W2 column, laid out as row (W2'^T, dim_out == 1)
      row 2, col 0 -> folded bias of Linear2            (b2')
    """
    eps = 1e-5
    x1 = x1_ref[...]                                   # (B, F1)
    x2 = x2_ref[...]                                   # (B, F2)

    # ---- BatchNorm1d(dim_in), training-mode batch statistics -------------
    # Per-feature stats: the two concatenated halves normalize independently.
    mu_a = jnp.mean(x1, axis=0, keepdims=True)
    xc1 = x1 - mu_a
    var_a = jnp.mean(xc1 * xc1, axis=0, keepdims=True)
    xn1 = xc1 * jax.lax.rsqrt(var_a + eps)

    mu_b = jnp.mean(x2, axis=0, keepdims=True)
    xc2 = x2 - mu_b
    var_b = jnp.mean(xc2 * xc2, axis=0, keepdims=True)
    xn2 = xc2 * jax.lax.rsqrt(var_b + eps)

    # ---- Linear(dim_in, dim_in // 2) with folded BN1 affine ---------------
    b1 = vec_ref[0:1, :]                               # (1, H)
    h = (jnp.dot(xn1, w1a_ref[...], preferred_element_type=jnp.float32)
         + jnp.dot(xn2, w1b_ref[...], preferred_element_type=jnp.float32)
         + b1)

    # ---- LeakyReLU(0.2): single VALU max ----------------------------------
    h = jnp.maximum(h, 0.2 * h)

    # ---- BatchNorm1d(dim_in // 2) + Linear(dim_in // 2, 1) + ReLU ----------
    # Reordered:  ((h - mu2) * r) @ w2' + b2'  ==  (h - mu2) @ (r * w2') + b2'
    # so the centered tensor computed for the variance is reused directly and
    # the per-feature rsqrt scale is applied to the (1, H) weight row, not to
    # the full (B, H) activation.  dim_out == 1 -> VPU multiply + lane reduce
    # instead of a 1-column MXU matmul.
    mu2 = jnp.mean(h, axis=0, keepdims=True)
    hc = h - mu2
    var2 = jnp.mean(hc * hc, axis=0, keepdims=True)
    r = jax.lax.rsqrt(var2 + eps)                      # (1, H)

    w2_row = vec_ref[1:2, :] * r                       # (1, H) folded+scaled
    b2 = vec_ref[2:3, 0:1]                             # (1, 1)
    o = jnp.sum(hc * w2_row, axis=1, keepdims=True) + b2
    out_ref[...] = jnp.maximum(o, 0.0)


def prepare_params(params, f1):
    """One-time parameter transform (NOT on the per-call path).

    Splits W1 along the concat boundary and folds the BN affine parameters
    into the Linear weights/biases.
    """
    g1 = params["g1"]            # (1, dim_in)
    be1 = params["be1"]          # (1, dim_in)
    w1 = params["w1"]            # (dim_in, H)
    b1 = params["b1"]            # (1, H)
    g2 = params["g2"]            # (1, H)
    be2 = params["be2"]          # (1, H)
    w2 = params["w2"]            # (H, 1)
    b2 = params["b2"]            # (1, 1)

    w1f = w1 * g1[0][:, None]                 # fold gamma1 (row scale)
    b1f = b1 + be1 @ w1                       # fold beta1
    w1a = w1f[:f1]                            # rows multiplying x1's features
    w1b = w1f[f1:]                            # rows multiplying x2's features

    w2f = w2 * g2[0][:, None]                 # fold gamma2
    b2f = b2 + be2 @ w2                       # fold beta2, (1, 1)

    H = w1.shape[1]
    vec = jnp.zeros((3, H), jnp.float32)
    vec = vec.at[0].set(b1f[0])
    vec = vec.at[1].set(w2f[:, 0])
    vec = vec.at[2, 0].set(b2f[0, 0])
    return {
        "w1a": w1a.astype(jnp.float32),
        "w1b": w1b.astype(jnp.float32),
        "vec": vec,
    }


def mlp_t_forward(x1, x2, lambda_, prepped):
    """x1, x2: (B, F1), (B, F2) row-major feature matrices."""
    del lambda_  # unused by the reference forward; kept for API parity
    B = x1.shape[0]
    dim_out = 1

    inputs = (
        x1.astype(jnp.float32),
        x2.astype(jnp.float32),
        prepped["w1a"],
        prepped["w1b"],
        prepped["vec"],
    )

    # All inputs are 2-D; whole-array blocks, single grid point, all VMEM-
    # resident.  Explicit (0, 0) index maps (no late-binding over `a`).
    in_specs = [
        pl.BlockSpec(a.shape, lambda: (0, 0),
                     memory_space=pltpu.MemorySpace.VMEM)
        for a in inputs
    ]
    out_spec = pl.BlockSpec((B, dim_out), lambda: (0, 0),
                            memory_space=pltpu.MemorySpace.VMEM)

    return pl.pallas_call(
        _mlp_t_kernel,
        out_shape=jax.ShapeDtypeStruct((B, dim_out), jnp.float32),
        in_specs=in_specs,
        out_specs=out_spec,
    )(*inputs)


def init_params(key, dim_in=200, dim_out=1):
    """Deterministic synthetic init mirroring the PyTorch module shapes."""
    dim_half = dim_in // 2
    k = jax.random.split(key, 8)
    lim1 = 1.0 / jnp.sqrt(dim_in)
    lim2 = 1.0 / jnp.sqrt(dim_half)
    return {
        # BatchNorm1d(dim_in) affine params (gamma, beta), stored as (1, D)
        "g1": 1.0 + 0.1 * jax.random.normal(k[0], (1, dim_in), jnp.float32),
        "be1": 0.1 * jax.random.normal(k[1], (1, dim_in), jnp.float32),
        # Linear(dim_in, dim_half): weight stored transposed (in, out)
        "w1": jax.random.uniform(k[2], (dim_in, dim_half), jnp.float32, -lim1, lim1),
        "b1": jax.random.uniform(k[3], (1, dim_half), jnp.float32, -lim1, lim1),
        # BatchNorm1d(dim_half)
        "g2": 1.0 + 0.1 * jax.random.normal(k[4], (1, dim_half), jnp.float32),
        "be2": 0.1 * jax.random.normal(k[5], (1, dim_half), jnp.float32),
        # Linear(dim_half, dim_out)
        "w2": jax.random.uniform(k[6], (dim_half, dim_out), jnp.float32, -lim2, lim2),
        "b2": jax.random.uniform(k[7], (1, dim_out), jnp.float32, -lim2, lim2),
    }


def _reference(x1, x2, params):
    """Pure-JAX reference with the ORIGINAL (unfolded) parameters."""
    eps = 1e-5
    x = jnp.concatenate([x1, x2], axis=1).reshape(x1.shape[0], -1).astype(jnp.float32)
    mu1 = x.mean(0, keepdims=True)
    v1 = ((x - mu1) ** 2).mean(0, keepdims=True)
    xn = (x - mu1) / jnp.sqrt(v1 + eps) * params["g1"] + params["be1"]
    h = xn @ params["w1"] + params["b1"]
    h = jnp.where(h >= 0, h, 0.2 * h)
    mu2 = h.mean(0, keepdims=True)
    v2 = ((h - mu2) ** 2).mean(0, keepdims=True)
    hn = (h - mu2) / jnp.sqrt(v2 + eps) * params["g2"] + params["be2"]
    o = hn @ params["w2"] + params["b2"]
    return jnp.maximum(o, 0.0)


if __name__ == "__main__":
    key = jax.random.PRNGKey(0)
    k_p, k_x1, k_x2 = jax.random.split(key, 3)

    B = 8
    dim_in = 200          # module default
    dim_out = 1
    half = dim_in // 2    # x1 and x2 each contribute half the features

    params = init_params(k_p, dim_in=dim_in, dim_out=dim_out)
    prepped = prepare_params(params, f1=half)   # one-time weight transform

    x1 = jax.random.normal(k_x1, (B, half), jnp.float32)
    x2 = jax.random.normal(k_x2, (B, half), jnp.float32)
    lambda_ = 1.0  # unused by the forward pass (matches reference semantics)

    out = mlp_t_forward(x1, x2, lambda_, prepped)
    out = jax.block_until_ready(out)

    ref = _reference(x1, x2, params)
    assert out.shape == (B, dim_out), out.shape
    assert jnp.allclose(out, ref, atol=1e-4, rtol=1e-4), float(jnp.abs(out - ref).max())

    print("KERNEL_OK")
</pallas_src>

<mosaic_0001>
module attributes {stable_mosaic.version = 11 : i64} {
  func.func @_mlp_t_kernel(%arg0: memref<8x100xf32, #tpu.memory_space<vmem>>, %arg1: memref<8x100xf32, #tpu.memory_space<vmem>>, %arg2: memref<100x100xf32, #tpu.memory_space<vmem>>, %arg3: memref<100x100xf32, #tpu.memory_space<vmem>>, %arg4: memref<3x100xf32, #tpu.memory_space<vmem>>, %arg5: memref<8x1xf32, #tpu.memory_space<vmem>>) attributes {dimension_semantics = [], scalar_prefetch = 0 : i64, scratch_operands = 0 : i64, tpu.core_type = #tpu.core_type<tc>} {
    %c0 = arith.constant 0 : index
    %c0_0 = arith.constant 0 : index
    %0 = vector.load %arg0[%c0, %c0_0] : memref<8x100xf32, #tpu.memory_space<vmem>>, vector<8x100xf32>
    %c0_1 = arith.constant 0 : index
    %c0_2 = arith.constant 0 : index
    %1 = vector.load %arg1[%c0_1, %c0_2] : memref<8x100xf32, #tpu.memory_space<vmem>>, vector<8x100xf32>
    %cst = arith.constant dense<0.000000e+00> : vector<100xf32>
    %2 = vector.multi_reduction <add>, %0, %cst [0] : vector<8x100xf32> to vector<100xf32>
    %3 = vector.shape_cast %2 : vector<100xf32> to vector<1x100xf32>
    %cst_3 = arith.constant 8.000000e+00 : f32
    %4 = vector.broadcast %cst_3 : f32 to vector<1x100xf32>
    %5 = arith.divf %3, %4 : vector<1x100xf32>
    %6 = vector.broadcast %5 : vector<1x100xf32> to vector<8x100xf32>
    %7 = arith.subf %0, %6 : vector<8x100xf32>
    %8 = arith.mulf %7, %7 : vector<8x100xf32>
    %cst_4 = arith.constant dense<0.000000e+00> : vector<100xf32>
    %9 = vector.multi_reduction <add>, %8, %cst_4 [0] : vector<8x100xf32> to vector<100xf32>
    %10 = vector.shape_cast %9 : vector<100xf32> to vector<1x100xf32>
    %cst_5 = arith.constant 8.000000e+00 : f32
    %11 = vector.broadcast %cst_5 : f32 to vector<1x100xf32>
    %12 = arith.divf %10, %11 : vector<1x100xf32>
    %cst_6 = arith.constant 9.99999974E-6 : f32
    %13 = vector.broadcast %cst_6 : f32 to vector<1x100xf32>
    %14 = arith.addf %12, %13 : vector<1x100xf32>
    %15 = math.rsqrt %14 : vector<1x100xf32>
    %16 = vector.broadcast %15 : vector<1x100xf32> to vector<8x100xf32>
    %17 = arith.mulf %7, %16 : vector<8x100xf32>
    %cst_7 = arith.constant dense<0.000000e+00> : vector<100xf32>
    %18 = vector.multi_reduction <add>, %1, %cst_7 [0] : vector<8x100xf32> to vector<100xf32>
    %19 = vector.shape_cast %18 : vector<100xf32> to vector<1x100xf32>
    %cst_8 = arith.constant 8.000000e+00 : f32
    %20 = vector.broadcast %cst_8 : f32 to vector<1x100xf32>
    %21 = arith.divf %19, %20 : vector<1x100xf32>
    %22 = vector.broadcast %21 : vector<1x100xf32> to vector<8x100xf32>
    %23 = arith.subf %1, %22 : vector<8x100xf32>
    %24 = arith.mulf %23, %23 : vector<8x100xf32>
    %cst_9 = arith.constant dense<0.000000e+00> : vector<100xf32>
    %25 = vector.multi_reduction <add>, %24, %cst_9 [0] : vector<8x100xf32> to vector<100xf32>
    %26 = vector.shape_cast %25 : vector<100xf32> to vector<1x100xf32>
    %cst_10 = arith.constant 8.000000e+00 : f32
    %27 = vector.broadcast %cst_10 : f32 to vector<1x100xf32>
    %28 = arith.divf %26, %27 : vector<1x100xf32>
    %cst_11 = arith.constant 9.99999974E-6 : f32
    %29 = vector.broadcast %cst_11 : f32 to vector<1x100xf32>
    %30 = arith.addf %28, %29 : vector<1x100xf32>
    %31 = math.rsqrt %30 : vector<1x100xf32>
    %32 = vector.broadcast %31 : vector<1x100xf32> to vector<8x100xf32>
    %33 = arith.mulf %23, %32 : vector<8x100xf32>
    %c0_12 = arith.constant 0 : index
    %c0_13 = arith.constant 0 : index
    %34 = vector.load %arg4[%c0_12, %c0_13] : memref<3x100xf32, #tpu.memory_space<vmem>>, vector<1x100xf32>
    %c0_14 = arith.constant 0 : index
    %c0_15 = arith.constant 0 : index
    %35 = vector.load %arg2[%c0_14, %c0_15] : memref<100x100xf32, #tpu.memory_space<vmem>>, vector<100x100xf32>
    %cst_16 = arith.constant dense<0.000000e+00> : vector<8x100xf32>
    %36 = tpu.matmul %17, %35, %cst_16 {dimension_numbers = #tpu.dot_dimension_numbers<[1], [0], [0], [1], [0, 0, 1, 1], [], []>} : vector<8x100xf32>, vector<100x100xf32>, vector<8x100xf32> -> vector<8x100xf32>
    %c0_17 = arith.constant 0 : index
    %c0_18 = arith.constant 0 : index
    %37 = vector.load %arg3[%c0_17, %c0_18] : memref<100x100xf32, #tpu.memory_space<vmem>>, vector<100x100xf32>
    %cst_19 = arith.constant dense<0.000000e+00> : vector<8x100xf32>
    %38 = tpu.matmul %33, %37, %cst_19 {dimension_numbers = #tpu.dot_dimension_numbers<[1], [0], [0], [1], [0, 0, 1, 1], [], []>} : vector<8x100xf32>, vector<100x100xf32>, vector<8x100xf32> -> vector<8x100xf32>
    %39 = arith.addf %36, %38 : vector<8x100xf32>
    %40 = vector.broadcast %34 : vector<1x100xf32> to vector<8x100xf32>
    %41 = arith.addf %39, %40 : vector<8x100xf32>
    %cst_20 = arith.constant 2.000000e-01 : f32
    %42 = vector.broadcast %cst_20 : f32 to vector<8x100xf32>
    %43 = arith.mulf %42, %41 : vector<8x100xf32>
    %44 = arith.maximumf %41, %43 : vector<8x100xf32>
    %cst_21 = arith.constant dense<0.000000e+00> : vector<100xf32>
    %45 = vector.multi_reduction <add>, %44, %cst_21 [0] : vector<8x100xf32> to vector<100xf32>
    %46 = vector.shape_cast %45 : vector<100xf32> to vector<1x100xf32>
    %cst_22 = arith.constant 8.000000e+00 : f32
    %47 = vector.broadcast %cst_22 : f32 to vector<1x100xf32>
    %48 = arith.divf %46, %47 : vector<1x100xf32>
    %49 = vector.broadcast %48 : vector<1x100xf32> to vector<8x100xf32>
    %50 = arith.subf %44, %49 : vector<8x100xf32>
    %51 = arith.mulf %50, %50 : vector<8x100xf32>
    %cst_23 = arith.constant dense<0.000000e+00> : vector<100xf32>
    %52 = vector.multi_reduction <add>, %51, %cst_23 [0] : vector<8x100xf32> to vector<100xf32>
    %53 = vector.shape_cast %52 : vector<100xf32> to vector<1x100xf32>
    %cst_24 = arith.constant 8.000000e+00 : f32
    %54 = vector.broadcast %cst_24 : f32 to vector<1x100xf32>
    %55 = arith.divf %53, %54 : vector<1x100xf32>
    %cst_25 = arith.constant 9.99999974E-6 : f32
    %56 = vector.broadcast %cst_25 : f32 to vector<1x100xf32>
    %57 = arith.addf %55, %56 : vector<1x100xf32>
    %58 = math.rsqrt %57 : vector<1x100xf32>
    %c1 = arith.constant 1 : index
    %c0_26 = arith.constant 0 : index
    %59 = vector.load %arg4[%c1, %c0_26] : memref<3x100xf32, #tpu.memory_space<vmem>>, vector<1x100xf32>
    %60 = arith.mulf %59, %58 : vector<1x100xf32>
    %c2 = arith.constant 2 : index
    %c0_27 = arith.constant 0 : index
    %61 = vector.load %arg4[%c2, %c0_27] : memref<3x100xf32, #tpu.memory_space<vmem>>, vector<1x1xf32>
    %62 = vector.broadcast %60 : vector<1x100xf32> to vector<8x100xf32>
    %63 = arith.mulf %50, %62 : vector<8x100xf32>
    %cst_28 = arith.constant dense<0.000000e+00> : vector<8xf32>
    %64 = vector.multi_reduction <add>, %63, %cst_28 [1] : vector<8x100xf32> to vector<8xf32>
    %65 = vector.shape_cast %64 : vector<8xf32> to vector<8x1xf32>
    %66 = vector.broadcast %61 : vector<1x1xf32> to vector<8x1xf32>
    %67 = arith.addf %65, %66 : vector<8x1xf32>
    %cst_29 = arith.constant 0.000000e+00 : f32
    %68 = vector.broadcast %cst_29 : f32 to vector<8x1xf32>
    %69 = arith.maximumf %67, %68 : vector<8x1xf32>
    %c0_30 = arith.constant 0 : index
    %c0_31 = arith.constant 0 : index
    %70 = vector.load %arg5[%c0_30, %c0_31] : memref<8x1xf32, #tpu.memory_space<vmem>>, vector<8x1xf32>
    tpu.vector_store %arg5[%c0_30, %c0_31], %69 {strides = array<i32>} : memref<8x1xf32, #tpu.memory_space<vmem>>, vector<8x1xf32>,
    return
  }
}

</mosaic_0001>

<bundles_post_ra>
// kernel: tpu_custom_call.1
= control target key start
LH: loop header
LB: loop body
LE: loop exit
PB: predicated region body
PF: predicated region fallthrough
CT: control target
= control target key end

     0   :  { %10 = vsyncpa [#allocation3], 0  ;;  %s523_s0 = inlined_call_operand.hbm [shape: f32[8,100], index: 0, kind: input, shape index: {}]   ;;  %s524_s1 = inlined_call_operand.hbm [shape: f32[8,100], index: 1, kind: input, shape index: {}]   ;;  %s525_s2 = inlined_call_operand.hbm [shape: f32[100,100], index: 2, kind: input, shape index: {}]   ;;  %s526_s3 = inlined_call_operand.hbm [shape: f32[100,100], index: 3, kind: input, shape index: {}]   ;;  %s527_s4 = inlined_call_operand.hbm [shape: f32[3,100], index: 4, kind: input, shape index: {}]   ;;  %s528_s5 = inlined_call_operand.vmem [shape: f32[8,1], index: 5, kind: output, shape index: {}]  }
   0x1   :  { %11 = vsyncpa [#allocation5], 0  ;;  %s29_s20 = sshll.u32 %s524_s1, 4  ;;  %s30_s20 = int_to_ptr.hbm [resolvable:$true] %s29_s20 }
   0x2   :  { %12 = vsyncpa [#allocation8], 0  ;;  %s443_s21 = smov [#allocation4]   ;;  %s52_s25 = sshll.u32 %s526_s3, 4  ;;  %s53_s25 = int_to_ptr.hbm [resolvable:$true] %s52_s25 }
   0x3   :  { %s31_s22 = sshll.u32 %s443_s21, 4  ;;  %s444_s26 = smov [#allocation7]   ;;  %s32_s22 = int_to_ptr.vmem [resolvable:$true] %s31_s22 }
   0x4   :  { %34 = dma.hbm_to_vmem [thread:$0]  %s30_s20, 128, %s32_s22, [#allocation5]  }
   0x5   :  { %s54_s27 = sshll.u32 %s444_s26, 4  ;;  %s18_s30 = sshll.u32 %s523_s0, 4  ;;  %s55_s27 = int_to_ptr.vmem [resolvable:$true] %s54_s27  ;;  %s19_s30 = int_to_ptr.hbm [resolvable:$true] %s18_s30 }
   0x6   :  { %s445_s1 = smov 128   ;;  %s446_s6 = smov 8  }
   0x7   :  { %60 = dma.hbm_to_vmem [thread:$0]  %s53_s25, 1664, %s55_s27, [#allocation8], %s445_s1, %s445_s1, %s446_s6  }
   0x8   :  { %s39_s9 = sshll.u32 %s525_s2, 4  ;;  %s447_s10 = smov [#allocation2]   ;;  %s40_s9 = int_to_ptr.hbm [resolvable:$true] %s39_s9 }
   0x9   :  { %s20_s11 = sshll.u32 %s447_s10, 4  ;;  %s448_s3 = smov [#allocation6]   ;;  %s21_s11 = int_to_ptr.vmem [resolvable:$true] %s20_s11 }
   0xa   :  { %23 = dma.hbm_to_vmem [thread:$0]  %s19_s30, 128, %s21_s11, [#allocation3]  }
   0xb   :  { %s41_s12 = sshll.u32 %s448_s3, 4  ;;  %s66_s0 = sshll.u32 %s527_s4, 4  ;;  %s42_s12 = int_to_ptr.vmem [resolvable:$true] %s41_s12  ;;  %s67_s0 = int_to_ptr.hbm [resolvable:$true] %s66_s0 }
   0xc   :  { %47 = dma.hbm_to_vmem [thread:$0]  %s40_s9, 1664, %s42_s12, [#allocation5], %s445_s1, %s445_s1, %s446_s6  }
   0xd   :  { %s449_s15 = smov [#allocation9]  }
   0xe   :  { %s68_s16 = sshll.u32 %s449_s15, 4  ;;  %s69_s16 = int_to_ptr.vmem [resolvable:$true] %s68_s16 }
   0xf   :  { %71 = dma.hbm_to_vmem [thread:$0]  %s67_s0, 64, %s69_s16, [#allocation8]  }
  0x10   :  { %437 = dma.done.wait [#allocation3], 128  }
  0x11   :  { %438 = vsyncadd [#allocation3], 4294967168 }
  0x12   :  { %439 = dma.done.wait [#allocation5], 1792  }
  0x13   :  { %440 = vsyncadd [#allocation5], 4294965504 }
  0x14   :  { %441 = dma.done.wait [#allocation8], 1728  }
  0x15   :  { %442 = vsyncadd [#allocation8], 4294965568  ;;  %v450_v0 = vmov 8.0   ;;  %vm192_vm0 = vcmask 1043456   ;;  %v188_v2 = vld [vmem:[#allocation7 + $0x60] sm:$0xf] }
  0x16   :  { %309 = vrcp.f32 %v450_v0  ;;  %v175_v3 = vld [vmem:[#allocation6 + $0x60] sm:$0xf]  ;;  %295 = vmatpush.msk.msra.mxu0 %vm192_vm0, %v188_v2  ;;  %v174_v5 = vld [vmem:[#allocation6 + $0x58] sm:$0xff]  ;;  %v173_v7 = vld [vmem:[#allocation6 + $0x50] sm:$0xff]  ;;  %vm94_vm1 = vcmask 818176   ;;  %vm286_vm12 = vcmask 7168  }
  0x17   :  { %v187_v4 = vld [vmem:[#allocation7 + $0x58] sm:$0xff]  ;;  %297 = vmatpush.msk.msra.mxu1 %vm192_vm0, %v175_v3  ;;  %v186_v6 = vld [vmem:[#allocation7 + $0x50] sm:$0xff]  ;;  %v185_v9 = vld [vmem:[#allocation7 + $0x48] sm:$0xff] }
  0x18   :  { %200 = vmatpush.msra.mxu0 %v187_v4  ;;  %v172_v10 = vld [vmem:[#allocation6 + $0x48] sm:$0xff]  ;;  %v171_v12 = vld [vmem:[#allocation6 + $0x40] sm:$0xff]  ;;  %v170_v15 = vld [vmem:[#allocation6 + $0x38] sm:$0xff] }
  0x19   :  { %226 = vmatpush.msra.mxu1 %v174_v5  ;;  %v184_v11 = vld [vmem:[#allocation7 + $0x40] sm:$0xff]  ;;  %v183_v14 = vld [vmem:[#allocation7 + $0x38] sm:$0xff]  ;;  %v93_v16 = vld [vmem:[#allocation4] sm:$0xff] }
  0x1a   :  { %201 = vmatpush.msra.mxu0 %v186_v6  ;;  %v132_v17 = vsel %vm94_vm1, %v93_v16, 0.0  ;;  %v92_v18 = vld [vmem:[#allocation2] sm:$0xff]  ;;  %v182_v19 = vld [vmem:[#allocation7 + $0x30] sm:$0xff]  ;;  %v168_v26 = vld [vmem:[#allocation6 + $0x28] sm:$0xff] }
  0x1b   :  { %227 = vmatpush.msra.mxu1 %v173_v7  ;;  %v169_v20 = vld [vmem:[#allocation6 + $0x30] sm:$0xff]  ;;  %v133_v21 = vrot.slane %v132_v17, 4  ;;  %v95_v22 = vsel %vm94_vm1, %v92_v18, 0.0  ;;  %v180_v29 = vld [vmem:[#allocation7 + $0x20] sm:$0xff]  ;;  %v167_v30 = vld [vmem:[#allocation6 + $0x20] sm:$0xff] }
  0x1c   :  { %v496_v1 = vpop.eup %309  ;;  %202 = vmatpush.msra.mxu0 %v185_v9  ;;  %v96_v24 = vrot.slane %v95_v22, 4  ;;  %v181_v25 = vld [vmem:[#allocation7 + $0x28] sm:$0xff]  ;;  %v179_v34 = vld [vmem:[#allocation7 + $0x18] sm:$0xff]  ;;  %v166_v35 = vld [vmem:[#allocation6 + $0x18] sm:$0xff] }
  0x1d   :  { %v103_v8 = vmul.f32 8.0, %v496_v1  ;;  %228 = vmatpush.msra.mxu1 %v172_v10  ;;  %v134_v27 = vadd.f32 %v133_v21, %v132_v17  ;;  %vm107_vm2 = vweird.f32 %v496_v1  ;;  %v178_v38 = vld [vmem:[#allocation7 + $0x10] sm:$0xff]  ;;  %v165_v39 = vld [vmem:[#allocation6 + $0x10] sm:$0xff]  ;;  %v164_v44 = vld [vmem:[#allocation6 + $0x8] sm:$0xff] }
  0x1e   :  { %203 = vmatpush.msra.mxu0 %v184_v11  ;;  %v97_v28 = vadd.f32 %v96_v24, %v95_v22  ;;  %v177_v43 = vld [vmem:[#allocation7 + $0x8] sm:$0xff]  ;;  %v176_v47 = vld [vmem:[#allocation7] sm:$0xff]  ;;  %v163_v48 = vld [vmem:[#allocation6] sm:$0xff] }
  0x1f   :  { %v104_v13 = vsub.f32 1.0, %v103_v8  ;;  %229 = vmatpush.msra.mxu1 %v171_v12  ;;  %v135_v31 = vrot.slane %v134_v27, 2 }
  0x20   :  { %204 = vmatpush.msra.mxu0 %v183_v14  ;;  %v98_v33 = vrot.slane %v97_v28, 2 }
  0x21   :  { %230 = vmatpush.msra.mxu1 %v170_v15  ;;  %v105_v23 = vmul.f32 %v496_v1, %v104_v13  ;;  %v136_v36 = vadd.f32 %v135_v31, %v134_v27 }
  0x22   :  { %205 = vmatpush.msra.mxu0 %v182_v19  ;;  %v99_v37 = vadd.f32 %v98_v33, %v97_v28 }
  0x23   :  { %231 = vmatpush.msra.mxu1 %v169_v20  ;;  %v106_v32 = vadd.f32 %v496_v1, %v105_v23  ;;  %v137_v40 = vrot.slane %v136_v36, 1 }
  0x24   :  { %206 = vmatpush.msra.mxu0 %v181_v25  ;;  %v100_v42 = vrot.slane %v99_v37, 1 }
  0x25   :  { %232 = vmatpush.msra.mxu1 %v168_v26  ;;  %v505_v41 = vsel %vm107_vm2, %v496_v1, %v106_v32  ;;  %v138_v45 = vadd.f32 %v137_v40, %v136_v36  ;;  %v307_v26 = vld [vmem:[#allocation9] ss:$0 sm:$0xff] }
  0x26   :  { %207 = vmatpush.msra.mxu0 %v180_v29  ;;  %v101_v46 = vadd.f32 %v100_v42, %v99_v37 }
  0x27   :  { %233 = vmatpush.msra.mxu1 %v167_v30  ;;  %v139_v49 = vmul.f32 %v138_v45, %v505_v41 }
  0x28   :  { %208 = vmatpush.msra.mxu0 %v179_v34  ;;  %v109_v50 = vmul.f32 %v505_v41, %v101_v46 }
  0x29   :  { %234 = vmatpush.msra.mxu1 %v166_v35  ;;  %v140_v51 = vsub.f32 %v93_v16, %v139_v49 }
  0x2a   :  { %209 = vmatpush.msra.mxu0 %v178_v38  ;;  %v110_v52 = vsub.f32 %v92_v18, %v109_v50 }
  0x2b   :  { %235 = vmatpush.msra.mxu1 %v165_v39  ;;  %v141_v53 = vmul.f32 %v140_v51, %v140_v51 }
  0x2c   :  { %210 = vmatpush.msra.mxu0 %v177_v43  ;;  %v111_v54 = vmul.f32 %v110_v52, %v110_v52 }
  0x2d   :  { %236 = vmatpush.msra.mxu1 %v164_v44  ;;  %v142_v55 = vsel %vm94_vm1, %v141_v53, 0.0 }
  0x2e   :  { %211 = vmatpush.msra.mxu0 %v176_v47  ;;  %v143_v56 = vrot.slane %v142_v55, 4  ;;  %v112_v57 = vsel %vm94_vm1, %v111_v54, 0.0 }
  0x2f   :  { %237 = vmatpush.msra.mxu1 %v163_v48  ;;  %v113_v58 = vrot.slane %v112_v57, 4 }
  0x30   :  { %v144_v59 = vadd.f32 %v143_v56, %v142_v55 }
  0x31   :  { %v114_v60 = vadd.f32 %v113_v58, %v112_v57  ;;  %v275_v58 = vld [vmem:[#allocation9 + $0x1] sm:$0x1] }
  0x32   :  { %v145_v61 = vrot.slane %v144_v59, 2 }
  0x33   :  { %v115_v62 = vrot.slane %v114_v60, 2 }
  0x34   :  { %v146_v63 = vadd.f32 %v145_v61, %v144_v59 }
  0x35   :  { %v116_v0 = vadd.f32 %v115_v62, %v114_v60 }
  0x36   :  { %v147_v1 = vrot.slane %v146_v63, 1 }
  0x37   :  { %v117_v2 = vrot.slane %v116_v0, 1 }
  0x38   :  { %v148_v3 = vadd.f32 %v147_v1, %v146_v63 }
  0x39   :  { %v118_v4 = vadd.f32 %v117_v2, %v116_v0 }
  0x3a   :  { %v149_v5 = vmul.f32 %v148_v3, %v505_v41 }
  0x3b   :  { %v119_v6 = vmul.f32 %v118_v4, %v505_v41 }
  0x3c   :  { %v150_v7 = vadd.f32 1e-05, %v149_v5 }
  0x3d   :  { %v120_v8 = vadd.f32 1e-05, %v119_v6 }
  0x3e   :  { %311 = vrsqrt.f32 %v150_v7  ;;  %vm157_vm3 = vweird.f32 %v150_v7 }
  0x3f   :  { %313 = vrsqrt.f32 %v120_v8  ;;  %vm127_vm5 = vweird.f32 %v120_v8 }
  0x44   :  { %v312_v9 = vpop.eup %311 }
  0x45   :  { %v314_v10 = vpop.eup %313  ;;  %v152_v11 = vmul.f32 %v312_v9, %v150_v7  ;;  %vm158_vm4 = vweird.f32 %v312_v9 }
  0x46   :  { %v122_v12 = vmul.f32 %v314_v10, %v120_v8  ;;  %vm128_vm6 = vweird.f32 %v314_v10  ;;  %vm159_vm7 = vmor %vm157_vm3, %vm158_vm4 }
  0x47   :  { %v153_v13 = vmul.f32 %v312_v9, %v152_v11  ;;  %vm129_vm8 = vmor %vm127_vm5, %vm128_vm6 }
  0x48   :  { %v123_v14 = vmul.f32 %v314_v10, %v122_v12 }
  0x49   :  { %v154_v15 = vmul.f32 0.5, %v153_v13 }
  0x4a   :  { %v124_v16 = vmul.f32 0.5, %v123_v14 }
  0x4b   :  { %v155_v17 = vsub.f32 1.5, %v154_v15 }
  0x4c   :  { %v125_v18 = vsub.f32 1.5, %v124_v16 }
  0x4d   :  { %v156_v19 = vmul.f32 %v312_v9, %v155_v17 }
  0x4e   :  { %v126_v20 = vmul.f32 %v314_v10, %v125_v18 }
  0x4f   :  { %v160_v21 = vsel %vm159_vm7, %v312_v9, %v156_v19 }
  0x50   :  { %v161_v22 = vmul.f32 %v160_v21, %v140_v51  ;;  %v130_v23 = vsel %vm129_vm8, %v314_v10, %v126_v20 }
  0x51   :  { %v131_v24 = vmul.f32 %v130_v23, %v110_v52 }
  0x52   :  { %296 = vmatmul.msk.f32.vlgmr.msra.gmra.mxu0 %vm94_vm1, %v161_v22 }
  0x53   :  { %298 = vmatmul.msk.f32.vlgmr.msra.gmra.mxu1 %vm94_vm1, %v131_v24 }
  0xcf   :  { %v213_v25 = vpop.f32.mrf.mxu0 }
  0xd0   :  { %v239_v27 = vpop.f32.mrf.mxu1 }
  0xd1   :  { %v240_v28 = vadd.f32 %v239_v27, %v213_v25 }
  0xd3   :  { %v243_v29 = vadd.f32 %v307_v26, %v240_v28 }
  0xd5   :  { %v244_v30 = vmul.f32 0.2, %v243_v29 }
  0xd7   :  { %v245_v31 = vmax.f32 %v243_v29, %v244_v30 }
  0xd9   :  { %v246_v32 = vsel %vm94_vm1, %v245_v31, 0.0 }
  0xda   :  { %v247_v33 = vrot.slane %v246_v32, 4 }
  0xdc   :  { %v248_v34 = vadd.f32 %v247_v33, %v246_v32 }
  0xde   :  { %v249_v35 = vrot.slane %v248_v34, 2 }
  0xe0   :  { %v250_v36 = vadd.f32 %v249_v35, %v248_v34 }
  0xe2   :  { %v251_v37 = vrot.slane %v250_v36, 1 }
  0xe4   :  { %v252_v38 = vadd.f32 %v251_v37, %v250_v36 }
  0xe6   :  { %v253_v39 = vmul.f32 %v252_v38, %v505_v41 }
  0xe8   :  { %v254_v40 = vsub.f32 %v245_v31, %v253_v39 }
  0xea   :  { %v255_v42 = vmul.f32 %v254_v40, %v254_v40 }
  0xec   :  { %v256_v43 = vsel %vm94_vm1, %v255_v42, 0.0 }
  0xed   :  { %v257_v44 = vrot.slane %v256_v43, 4 }
  0xef   :  { %v258_v45 = vadd.f32 %v257_v44, %v256_v43 }
  0xf1   :  { %v259_v46 = vrot.slane %v258_v45, 2 }
  0xf3   :  { %v260_v47 = vadd.f32 %v259_v46, %v258_v45 }
  0xf5   :  { %v261_v48 = vrot.slane %v260_v47, 1 }
  0xf7   :  { %v262_v49 = vadd.f32 %v261_v48, %v260_v47 }
  0xf9   :  { %v263_v50 = vmul.f32 %v262_v49, %v505_v41  ;;  %v308_v41 = vld [vmem:[#allocation9 + $0x2] ss:$0 sm:$0xff] }
  0xfb   :  { %v264_v51 = vadd.f32 1e-05, %v263_v50 }
  0xfd   :  { %315 = vrsqrt.f32 %v264_v51  ;;  %vm271_vm10 = vweird.f32 %v264_v51 }
 0x103   :  { %v316_v52 = vpop.eup %315 }
 0x104   :  { %v266_v53 = vmul.f32 %v316_v52, %v264_v51  ;;  %vm272_vm9 = vweird.f32 %v316_v52 }
 0x105   :  { %vm273_vm11 = vmor %vm271_vm10, %vm272_vm9 }
 0x106   :  { %v267_v54 = vmul.f32 %v316_v52, %v266_v53 }
 0x108   :  { %v268_v55 = vmul.f32 0.5, %v267_v54 }
 0x10a   :  { %v269_v56 = vsub.f32 1.5, %v268_v55 }
 0x10c   :  { %v270_v57 = vmul.f32 %v316_v52, %v269_v56 }
 0x10e   :  { %v274_v59 = vsel %vm273_vm11, %v316_v52, %v270_v57 }
 0x10f   :  { %v276_v60 = vmul.f32 %v275_v58, %v274_v59 }
 0x111   :  { %v278_v61 = vperm.slane %v276_v60, 0 }
 0x113   :  { %v279_v62 = vmul.f32 %v278_v61, %v254_v40 }
 0x115   :  { %v280_v63 = vsel %vm94_vm1, %v279_v62, 0.0 }
 0x116   :  { %281 = vadd.xlane.f32.xlu0 %v280_v63 }
 0x189   :  { %v282_v0 = vpop.xlane.xlu0 %281 }
 0x18a   :  { %v284_v1 = vadd.f32 %v308_v41, %v282_v0 }
 0x18c   :  { %v285_v2 = vmax.f32 %v284_v1, 0.0 }
 0x18e   :  { %287 = vst.msk [vmem:[%s528_s5] sm:$0xff] %vm286_vm12, %v285_v2 }
 0x18f   :  { %292 = vsyncpa [#allocation3], 1 }
 0x190   :  { %293 = vsyncpa [#allocation5], 1 }
 0x191   :  { %294 = vsyncpa [#allocation8], 1 }

</bundles_post_ra>
